<compile_context>
chip_gen: v5e
topology: v5e:2x2
jax: 0.10.0
libtpu: 0.0.40
codegen_flags: <defaults>
</compile_context>

<pallas_src>
import functools

import jax
import jax.numpy as jnp
from jax.experimental import pallas as pl
from jax.experimental.pallas import tpu as pltpu


def _round_up(n, m):
    return ((n + m - 1) // m) * m


def _tree_sum(parts):
    """Balanced pairwise sum of a list of equal-shaped arrays."""
    parts = list(parts)
    while len(parts) > 1:
        nxt = []
        for i in range(0, len(parts) - 1, 2):
            nxt.append(parts[i] + parts[i + 1])
        if len(parts) % 2:
            nxt.append(parts[-1])
        parts = nxt
    return parts[0]


def _choose_row_tile(R, row_tile):
    """Pick the row (sublane) tile so the (1, tr) output block is legal."""
    R8 = _round_up(R, 8)
    if R8 <= row_tile and R <= 128:
        # Single row tile: output block equals the full output extent.
        # NOTE(v7x): with tiny R only one "parallel" row tile exists, so the
        # second TensorCore idles; splitting L into two parallel halves would
        # fix that but is not worth it at these sizes.
        return R8
    # Multiple row tiles: tr must be a multiple of 128 so the lane-dense
    # (1, tr) output block satisfies the (8, 128) block constraint.
    tr = min(_round_up(row_tile, 128), _round_up(R8, 128))
    if pl.cdiv(R, tr) < 2:
        # v7x megacore: ensure the "parallel" row axis has >= 2 tiles.
        tr = max(128, _round_up(pl.cdiv(R8, 2), 128))
    return tr


def _avg_pool_kernel(x_ref, out_ref, acc_ref, *, l_total, inv_l):
    """Grid = (row_tiles, l_tiles); L (reduction) is the last, 'arbitrary' axis.

    x_ref:   (TR, TL) input tile in VMEM (TL a multiple of 128)
    out_ref: (1, TR)  lane-dense per-row-tile output slab
    acc_ref: (TR, 128) f32 accumulator scratch, resident across the L loop
    """
    tr, tl = x_ref.shape
    n_chunks = tl // 128
    li = pl.program_id(1)
    last_li = pl.num_programs(1) - 1

    @pl.when(li == 0)
    def _init():
        acc_ref[...] = jnp.zeros_like(acc_ref)

    def accumulate(mask_tail):
        if mask_tail:
            col = jax.lax.broadcasted_iota(jnp.int32, (tr, 128), 1)
            valid_cols = l_total - li * tl  # in-bounds columns in this tile
        parts = []
        for k in range(n_chunks):
            chunk = x_ref[:, k * 128:(k + 1) * 128].astype(jnp.float32)
            if mask_tail:
                chunk = jnp.where(col + (k * 128) < valid_cols, chunk, 0.0)
            parts.append(chunk)
        # Tree-sum the lane chunks, then a single accumulator read-modify-write.
        acc_ref[...] += _tree_sum(parts)

    if l_total % tl != 0:
        # Last L tile extends past the true signal length: mask it in-kernel.
        @pl.when(li != last_li)
        def _body():
            accumulate(mask_tail=False)

        @pl.when(li == last_li)
        def _tail():
            accumulate(mask_tail=True)
    else:
        accumulate(mask_tail=False)

    @pl.when(li == last_li)
    def _finalize():
        # Single cross-lane (XLU) reduce per row tile; scale by the true 1/L.
        row_sum = jnp.sum(acc_ref[...], axis=-1)  # (TR,)
        out_ref[...] = (row_sum * inv_l)[None, :].astype(out_ref.dtype)


def average_pool(x, *, row_tile=256, lane_tile=None):
    """Pallas implementation of AveragePool.forward.

    Args:
      x: jnp.ndarray of shape (B, C, L)  (PyTorch NCL convention).
    Returns:
      (x, average_feature) with average_feature of shape (B, C).
    """
    B, C, L = x.shape
    R = B * C
    x2 = x.reshape(R, L)
    itemsize = jnp.dtype(x.dtype).itemsize

    # Row (sublane) tile.
    tr = _choose_row_tile(R, row_tile)

    # Lane tile: target ~2 MiB input blocks (measured >=85% HBM roofline sweet
    # spot on v5e/v6e/v7x), always a multiple of 128.
    if lane_tile is None:
        lane_tile = max(128, ((2 * 1024 * 1024) // (tr * itemsize)) // 128 * 128)
    else:
        lane_tile = max(128, _round_up(lane_tile, 128))
    tl = min(lane_tile, _round_up(L, 128))

    n_row_tiles = pl.cdiv(R, tr)
    n_l_tiles = pl.cdiv(L, tl)

    kernel = functools.partial(_avg_pool_kernel, l_total=L, inv_l=1.0 / L)

    # Optional third buffer when blocks are forced small but the grid is long
    # (hides per-step DMA issue latency, mainly a v7x concern).
    block_bytes = tr * tl * itemsize
    in_spec_kwargs = {}
    if block_bytes <= (1 << 20) and n_row_tiles * n_l_tiles >= 4:
        in_spec_kwargs["pipeline_mode"] = pl.Buffered(3)

    cost = pl.CostEstimate(
        flops=R * L,
        transcendentals=0,
        bytes_accessed=R * L * itemsize + R * itemsize,
    )

    out = pl.pallas_call(
        kernel,
        out_shape=jax.ShapeDtypeStruct((1, n_row_tiles * tr), x.dtype),
        grid_spec=pltpu.PrefetchScalarGridSpec(
            num_scalar_prefetch=0,
            grid=(n_row_tiles, n_l_tiles),
            in_specs=[
                pl.BlockSpec((tr, tl), lambda ri, li: (ri, li), **in_spec_kwargs)
            ],
            out_specs=pl.BlockSpec((1, tr), lambda ri, li: (0, ri)),
            scratch_shapes=[pltpu.VMEM((tr, 128), jnp.float32)],
        ),
        compiler_params=pltpu.CompilerParams(
            dimension_semantics=("parallel", "arbitrary"),
            vmem_limit_bytes=48 * 1024 * 1024,
        ),
        cost_estimate=cost,
    )(x2)

    # Garbage from the ragged last row tile (if any) is discarded here.
    avg = out.reshape(n_row_tiles * tr)[:R].reshape(B, C)
    # The module returns the input untouched alongside the pooled feature.
    return x, avg


if __name__ == "__main__":
    key = jax.random.PRNGKey(0)

    # Small shapes consistent with the module's forward: (B, C, L).
    B, C, L = 2, 4, 16
    x = jax.random.normal(key, (B, C, L), dtype=jnp.float32)

    x_out, avg = average_pool(x)
    jax.block_until_ready((x_out, avg))

    ref = jnp.mean(x, axis=-1)
    assert x_out.shape == (B, C, L)
    assert avg.shape == (B, C)
    assert jnp.allclose(avg, ref, atol=1e-5, rtol=1e-5)

    # Larger ragged-shape check: exercises multiple row tiles, multiple L tiles,
    # the in-kernel tail mask, and the discarded ragged last row tile.
    key2 = jax.random.PRNGKey(1)
    x_big = jax.random.normal(key2, (5, 60, 3000), dtype=jnp.float32)
    _, avg_big = average_pool(x_big)
    jax.block_until_ready(avg_big)
    ref_big = jnp.mean(x_big, axis=-1)
    assert avg_big.shape == (5, 60)
    assert jnp.allclose(avg_big, ref_big, atol=1e-5, rtol=1e-4)

    print("KERNEL_OK")
</pallas_src>

<mosaic_0001>
module attributes {stable_mosaic.version = 11 : i64} {
  func.func @_avg_pool_kernel(%arg0: i32, %arg1: i32, %arg2: memref<8x128xf32, #tpu.memory_space<vmem>>, %arg3: memref<1x8xf32, #tpu.memory_space<vmem>>, %arg4: memref<8x128xf32, #tpu.memory_space<vmem>>) attributes {dimension_semantics = [#tpu.dimension_semantics<parallel>, #tpu.dimension_semantics<arbitrary>], iteration_bounds = array<i64: 1, 1>, scalar_prefetch = 0 : i64, scratch_operands = 1 : i64, tpu.core_type = #tpu.core_type<tc>, window_params = [{transform_indices = @transform_0, window_bounds = array<i64: 8, 128>}, {transform_indices = @transform_1, window_bounds = array<i64: 1, 8>}]} {
    %c0_i32 = arith.constant 0 : i32
    %0 = arith.cmpi eq, %arg1, %c0_i32 : i32
    %1 = arith.extui %0 : i1 to i32
    %c0_i32_0 = arith.constant 0 : i32
    %2 = arith.cmpi ne, %1, %c0_i32_0 : i32
    scf.if %2 {
      %cst = arith.constant 0.000000e+00 : f32
      %12 = vector.broadcast %cst : f32 to vector<8x128xf32>
      %c0 = arith.constant 0 : index
      %c0_7 = arith.constant 0 : index
      %13 = vector.load %arg4[%c0, %c0_7] : memref<8x128xf32, #tpu.memory_space<vmem>>, vector<8x128xf32>
      tpu.vector_store %arg4[%c0, %c0_7], %12 {strides = array<i32>} : memref<8x128xf32, #tpu.memory_space<vmem>>, vector<8x128xf32>,
    } else {
    }
    %c0_i32_1 = arith.constant 0 : i32
    %3 = arith.cmpi ne, %arg1, %c0_i32_1 : i32
    %4 = arith.extui %3 : i1 to i32
    %c0_i32_2 = arith.constant 0 : i32
    %5 = arith.cmpi ne, %4, %c0_i32_2 : i32
    scf.if %5 {
      %c0 = arith.constant 0 : index
      %c0_7 = arith.constant 0 : index
      %12 = vector.load %arg2[%c0, %c0_7] : memref<8x128xf32, #tpu.memory_space<vmem>>, vector<8x128xf32>
      %c0_8 = arith.constant 0 : index
      %c0_9 = arith.constant 0 : index
      %13 = vector.load %arg4[%c0_8, %c0_9] : memref<8x128xf32, #tpu.memory_space<vmem>>, vector<8x128xf32>
      %14 = arith.addf %13, %12 : vector<8x128xf32>
      %c0_10 = arith.constant 0 : index
      %c0_11 = arith.constant 0 : index
      %15 = vector.load %arg4[%c0_10, %c0_11] : memref<8x128xf32, #tpu.memory_space<vmem>>, vector<8x128xf32>
      tpu.vector_store %arg4[%c0_10, %c0_11], %14 {strides = array<i32>} : memref<8x128xf32, #tpu.memory_space<vmem>>, vector<8x128xf32>,
    } else {
    }
    %c0_i32_3 = arith.constant 0 : i32
    %6 = arith.cmpi eq, %arg1, %c0_i32_3 : i32
    %7 = arith.extui %6 : i1 to i32
    %c0_i32_4 = arith.constant 0 : i32
    %8 = arith.cmpi ne, %7, %c0_i32_4 : i32
    scf.if %8 {
      %12 = tpu.iota {dimensions = array<i32: 1>} : vector<8x128xi32>
      %c128_i32 = arith.constant 128 : i32
      %13 = arith.muli %arg1, %c128_i32 : i32
      %c16_i32 = arith.constant 16 : i32
      %14 = arith.subi %c16_i32, %13 : i32
      %c0 = arith.constant 0 : index
      %c0_7 = arith.constant 0 : index
      %15 = vector.load %arg2[%c0, %c0_7] : memref<8x128xf32, #tpu.memory_space<vmem>>, vector<8x128xf32>
      %c0_i32_8 = arith.constant 0 : i32
      %16 = vector.broadcast %c0_i32_8 : i32 to vector<8x128xi32>
      %17 = arith.addi %12, %16 : vector<8x128xi32>
      %18 = vector.broadcast %14 : i32 to vector<8x128xi32>
      %19 = arith.cmpi slt, %17, %18 : vector<8x128xi32>
      %cst = arith.constant 0.000000e+00 : f32
      %20 = vector.broadcast %cst : f32 to vector<8x128xf32>
      %21 = arith.select %19, %15, %20 : vector<8x128xi1>, vector<8x128xf32>
      %c0_9 = arith.constant 0 : index
      %c0_10 = arith.constant 0 : index
      %22 = vector.load %arg4[%c0_9, %c0_10] : memref<8x128xf32, #tpu.memory_space<vmem>>, vector<8x128xf32>
      %23 = arith.addf %22, %21 : vector<8x128xf32>
      %c0_11 = arith.constant 0 : index
      %c0_12 = arith.constant 0 : index
      %24 = vector.load %arg4[%c0_11, %c0_12] : memref<8x128xf32, #tpu.memory_space<vmem>>, vector<8x128xf32>
      tpu.vector_store %arg4[%c0_11, %c0_12], %23 {strides = array<i32>} : memref<8x128xf32, #tpu.memory_space<vmem>>, vector<8x128xf32>,
    } else {
    }
    %c0_i32_5 = arith.constant 0 : i32
    %9 = arith.cmpi eq, %arg1, %c0_i32_5 : i32
    %10 = arith.extui %9 : i1 to i32
    %c0_i32_6 = arith.constant 0 : i32
    %11 = arith.cmpi ne, %10, %c0_i32_6 : i32
    scf.if %11 {
      %c0 = arith.constant 0 : index
      %c0_7 = arith.constant 0 : index
      %12 = vector.load %arg4[%c0, %c0_7] : memref<8x128xf32, #tpu.memory_space<vmem>>, vector<8x128xf32>
      %cst = arith.constant dense<0.000000e+00> : vector<8xf32>
      %13 = vector.multi_reduction <add>, %12, %cst [1] : vector<8x128xf32> to vector<8xf32>
      %cst_8 = arith.constant 6.250000e-02 : f32
      %14 = vector.broadcast %cst_8 : f32 to vector<8xf32>
      %15 = arith.mulf %13, %14 : vector<8xf32>
      %16 = vector.shape_cast %15 : vector<8xf32> to vector<1x8xf32>
      %c0_9 = arith.constant 0 : index
      %c0_10 = arith.constant 0 : index
      %17 = vector.load %arg3[%c0_9, %c0_10] : memref<1x8xf32, #tpu.memory_space<vmem>>, vector<1x8xf32>
      tpu.vector_store %arg3[%c0_9, %c0_10], %16 {strides = array<i32>} : memref<1x8xf32, #tpu.memory_space<vmem>>, vector<1x8xf32>,
    } else {
    }
    return
  }
  func.func @transform_0(%arg0: i32, %arg1: i32) -> (i32, i32) {
    %c0_i32 = arith.constant 0 : i32
    return %arg0, %arg1 : i32, i32
  }
  func.func @transform_1(%arg0: i32, %arg1: i32) -> (i32, i32) {
    %c0_i32 = arith.constant 0 : i32
    %c0_i32_0 = arith.constant 0 : i32
    return %c0_i32, %arg0 : i32, i32
  }
}

</mosaic_0001>

<bundles_post_ra>
// kernel: tpu_custom_call.1
= control target key start
LH: loop header
LB: loop body
LE: loop exit
PB: predicated region body
PF: predicated region fallthrough
CT: control target
= control target key end

     0   :  { %6 = vsyncpa [#allocation4], 0  ;;  %s148_s0 = inlined_call_operand.hbm [shape: f32[8,16], index: 0, kind: input, shape index: {}]   ;;  %s149_s1 = inlined_call_operand.hbm [shape: f32[1,8], index: 1, kind: output, shape index: {}]  }
   0x1   :  { %7 = vsyncpa [#allocation5], 0  ;;  %s13_s8 = sshll.u32 %s148_s0, 4  ;;  %s130_s9 = smov [#allocation3]   ;;  %s14_s8 = int_to_ptr.hbm [resolvable:$true] %s13_s8 }
   0x2   :  { %s15_s10 = sshll.u32 %s130_s9, 4  ;;  %s16_s10 = int_to_ptr.vmem [resolvable:$true] %s15_s10 }
   0x3   :  { %18 = dma.hbm_to_vmem [thread:$0]  %s14_s8, 128, %s16_s10, [#allocation4]  }
   0x4   :  { %126 = dma.done.wait [#allocation4], 128  }
   0x5   :  { %127 = vsyncadd [#allocation4], 4294967168  ;;  %v39_v0 = vlaneseq  ;;  %v43_v2 = vld [vmem:[#allocation3] sm:$0xff]  ;;  %s131_s11 = smov [#allocation6]   ;;  %s66_s0 = sshll.u32 %s149_s1, 4  ;;  %vm57_vm1 = vcmask 57344   ;;  %s67_s0 = int_to_ptr.hbm [resolvable:$true] %s66_s0 }
   0x6   :  { %s64_s12 = sshll.u32 %s131_s11, 4  ;;  %s65_s12 = int_to_ptr.vmem [resolvable:$true] %s64_s12 }
   0x7   :  { %v40_v1 = vand.u32 127, %v39_v0 }
   0x9   :  { %vm45_vm0 = vcmp.lt.s32.totalorder %v40_v1, 16 }
   0xa   :  { %v46_v3 = vsel %vm45_vm0, %v43_v2, 0.0 }
   0xb   :  { %51 = vadd.xlane.f32.xlu0 %v46_v3 }
  0x7e   :  { %v52_v4 = vpop.xlane.xlu0 %51 }
  0x7f   :  { %v53_v5 = vmul.f32 0.0625, %v52_v4 }
  0x81   :  { %v55_v6 = vperm.slane %v53_v5, %v40_v1 }
  0x83   :  { %58 = vst.msk [vmem:[#allocation6] sm:$0x1] %vm57_vm1, %v55_v6 }
  0x84   :  { %69 = dma.vmem_to_hbm [thread:$0]  %s65_s12, 16, %s67_s0, [#allocation5]  }
  0x85   :  { %128 = dma.done.wait [#allocation5], 16  }
  0x86   :  { %129 = vsyncadd [#allocation5], 4294967280 }
  0x87   :  { %74 = vsyncpa [#allocation4], 1 }
  0x88   :  { %75 = vsyncpa [#allocation5], 1 }

</bundles_post_ra>
